<compile_context>
chip_gen: v5e
topology: v5e:2x2
jax: 0.10.0
libtpu: 0.0.40
codegen_flags: <defaults>
</compile_context>

<pallas_src>
import functools

import jax
import jax.numpy as jnp
import numpy as np
from jax import lax
from jax.experimental import pallas as pl
from jax.experimental.pallas import tpu as pltpu

# Per-buffer f32 element budgets used to size tiles.  With double-buffered
# inputs + outputs this keeps live VMEM well under the explicit 32 MiB limit
# (safe on v5e / v6e / v7x).
_P1_BUDGET_ELEMS = 512 * 1024
_P2_BUDGET_ELEMS = 1024 * 1024
_VMEM_LIMIT_BYTES = 32 * 1024 * 1024


def _largest_divisor_leq(n, cap):
    cap = max(1, min(n, cap))
    for d in range(cap, 0, -1):
        if n % d == 0:
            return d
    return 1


def _pick_tile_c(C, HW, budget_elems):
    # tile_c must equal C or be a multiple of 8 (block-shape tiling rule).
    valid = [d for d in range(1, C + 1) if C % d == 0 and (d == C or d % 8 == 0)]
    fitting = [d for d in valid if d * HW <= budget_elems]
    return max(fitting) if fitting else min(valid)


def _band(n, lo, hi, out_rows):
    """(n, n) 0/1 band matrix M, M = 1 where lo <= input_idx - output_idx <= hi.

    out_rows=True  -> M[out, in]   (left multiply)
    out_rows=False -> M[in, out]   (right multiply)
    """
    r = lax.broadcasted_iota(jnp.int32, (n, n), 0)
    c = lax.broadcasted_iota(jnp.int32, (n, n), 1)
    d = (c - r) if out_rows else (r - c)          # = input_idx - output_idx
    return ((d >= lo) & (d <= hi)).astype(jnp.float32)


def _block_mask_kernel(u_ref, m_ref, *, gamma, block_size):
    tb, H, W = u_ref.shape
    p = block_size // 2
    lo, hi = -p, block_size - 1 - p               # window: input = output + d

    seed = (u_ref[...] < gamma).astype(jnp.float32)          # (tb, H, W) in {0,1}

    # Separable windowed *count* of seeds via two banded (batched) matmuls on
    # the MXU; since seed >= 0:  max_pool(seed) > 0  <=>  windowed sum > 0.
    ah = jnp.broadcast_to(_band(H, lo, hi, out_rows=True), (tb, H, H))   # [b,Hout,Hin]
    bw = jnp.broadcast_to(_band(W, lo, hi, out_rows=False), (tb, W, W))  # [b,Win,Wout]
    t = jnp.einsum("bhj,bjw->bhw", seed, bw, preferred_element_type=jnp.float32)
    cnt = jnp.einsum("bhi,biw->bhw", ah, t, preferred_element_type=jnp.float32)

    # block_mask = 1 - max_pool(seed)
    m_ref[...] = jnp.where(cnt > 0.5, 0.0, 1.0)


def _apply_kernel(scale_ref, m_ref, x_ref, o_ref):
    scale = scale_ref[0]                  # f32 scalar from SMEM
    m = m_ref[...]                        # (1, 1, HW)      f32 block mask
    x = x_ref[...]                        # (1, tile_c, HW) activations
    o_ref[...] = (x * (m * scale)).astype(o_ref.dtype)


def drop_block_2d(x, uniform, *, drop_prob, block_size, training=True):
    """Pallas implementation of DropBlock2D.forward.

    `uniform` plays the role of torch.rand(N, H, W) (U[0,1) values)."""
    assert x.ndim == 4, "Expected input with 4 dimensions (bsize, channels, height, width)"
    if (not training) or drop_prob == 0.0:
        return x
    # TODO(synk): milestone_step / scheduler_params are host-side training-state
    # updates of drop_prob, not part of the device compute path.

    N, C, H, W = x.shape
    assert uniform.shape == (N, H, W)
    gamma = float(drop_prob) / float(block_size ** 2)
    uniform = uniform.astype(jnp.float32)

    # ---------------- pass 1: block_mask (N, H, W) ----------------
    tile_b = _largest_divisor_leq(N, min(8, max(1, _P1_BUDGET_ELEMS // (H * W))))
    mask_kernel = functools.partial(
        _block_mask_kernel, gamma=gamma, block_size=block_size)
    block_mask = pl.pallas_call(
        mask_kernel,
        out_shape=jax.ShapeDtypeStruct((N, H, W), jnp.float32),
        grid=(N // tile_b,),
        in_specs=[pl.BlockSpec((tile_b, H, W), lambda i: (i, 0, 0))],
        out_specs=pl.BlockSpec((tile_b, H, W), lambda i: (i, 0, 0)),
        compiler_params=pltpu.CompilerParams(
            dimension_semantics=("parallel",),
            vmem_limit_bytes=_VMEM_LIMIT_BYTES),
    )(uniform)

    # -------- global scale (trivial XLA reduce over the small mask) --------
    numel = float(N * H * W)                       # block_mask.numel()
    scale = (numel / jnp.sum(block_mask)).astype(jnp.float32).reshape((1,))

    # ---------------- pass 2: out = x * block_mask * scale ----------------
    HW = H * W
    x3 = x.reshape(N, C, HW)                       # lane-dense last dim
    m3 = block_mask.reshape(N, 1, HW)
    tile_c = _pick_tile_c(C, HW, _P2_BUDGET_ELEMS)

    out3 = pl.pallas_call(
        _apply_kernel,
        out_shape=jax.ShapeDtypeStruct((N, C, HW), x.dtype),
        grid=(N, C // tile_c),
        in_specs=[
            pl.BlockSpec(memory_space=pltpu.MemorySpace.SMEM),       # scale (1,)
            pl.BlockSpec((1, 1, HW), lambda b, c: (b, 0, 0)),        # block mask
            pl.BlockSpec((1, tile_c, HW), lambda b, c: (b, c, 0)),   # x
        ],
        out_specs=pl.BlockSpec((1, tile_c, HW), lambda b, c: (b, c, 0)),
        compiler_params=pltpu.CompilerParams(
            dimension_semantics=("parallel", "parallel"),
            vmem_limit_bytes=_VMEM_LIMIT_BYTES),
    )(scale, m3, x3)

    return out3.reshape(N, C, H, W)


def _reference(x, u, drop_prob, block_size):
    # Plain-JAX reference (reduce_window == F.max_pool2d with stride 1).
    gamma = drop_prob / block_size ** 2
    seed = (u < gamma).astype(jnp.float32)                    # (N, H, W)
    p = block_size // 2
    pooled = lax.reduce_window(
        seed, -jnp.inf, lax.max,
        (1, block_size, block_size), (1, 1, 1),
        ((0, 0), (p, p), (p, p)))
    if block_size % 2 == 0:
        pooled = pooled[:, :-1, :-1]
    bm = 1.0 - pooled
    return x * bm[:, None, :, :] * (bm.size / jnp.sum(bm))


if __name__ == "__main__":
    B, C, H, W = 2, 4, 16, 16

    key = jax.random.PRNGKey(0)
    kx, ku = jax.random.split(key)
    x = jax.random.normal(kx, (B, C, H, W), dtype=jnp.float32)
    u = jax.random.uniform(ku, (B, H, W), dtype=jnp.float32)

    for drop_prob, block_size in [(0.1, 3), (0.2, 4)]:   # odd and even block sizes
        fn = jax.jit(functools.partial(
            drop_block_2d, drop_prob=drop_prob, block_size=block_size,
            training=True))
        out = jax.block_until_ready(fn(x, u))
        ref = _reference(x, u, drop_prob, block_size)
        np.testing.assert_allclose(
            np.asarray(out), np.asarray(ref), rtol=1e-5, atol=1e-6)

    print("KERNEL_OK")
</pallas_src>

<mosaic_0001>
module attributes {stable_mosaic.version = 11 : i64} {
  func.func @_block_mask_kernel(%arg0: i32, %arg1: memref<2x16x16xf32, #tpu.memory_space<vmem>>, %arg2: memref<2x16x16xf32, #tpu.memory_space<vmem>>) attributes {dimension_semantics = [#tpu.dimension_semantics<parallel>], iteration_bounds = array<i64: 1>, scalar_prefetch = 0 : i64, scratch_operands = 0 : i64, tpu.core_type = #tpu.core_type<tc>, window_params = [{transform_indices = @transform_0, window_bounds = array<i64: 2, 16, 16>}, {transform_indices = @transform_1, window_bounds = array<i64: 2, 16, 16>}]} {
    %c0 = arith.constant 0 : index
    %c0_0 = arith.constant 0 : index
    %c0_1 = arith.constant 0 : index
    %0 = vector.load %arg1[%c0, %c0_0, %c0_1] : memref<2x16x16xf32, #tpu.memory_space<vmem>>, vector<2x16x16xf32>
    %cst = arith.constant 0.0111111114 : f32
    %1 = vector.broadcast %cst : f32 to vector<2x16x16xf32>
    %2 = arith.cmpf olt, %0, %1 : vector<2x16x16xf32>
    %3 = arith.extui %2 : vector<2x16x16xi1> to vector<2x16x16xi32>
    %4 = arith.sitofp %3 : vector<2x16x16xi32> to vector<2x16x16xf32>
    %5 = tpu.iota {dimensions = array<i32: 0>} : vector<16x16xi32>
    %6 = tpu.iota {dimensions = array<i32: 1>} : vector<16x16xi32>
    %7 = arith.subi %6, %5 : vector<16x16xi32>
    %c-1_i32 = arith.constant -1 : i32
    %8 = vector.broadcast %c-1_i32 : i32 to vector<16x16xi32>
    %9 = arith.cmpi sge, %7, %8 : vector<16x16xi32>
    %c1_i32 = arith.constant 1 : i32
    %10 = vector.broadcast %c1_i32 : i32 to vector<16x16xi32>
    %11 = arith.cmpi sle, %7, %10 : vector<16x16xi32>
    %12 = arith.andi %9, %11 : vector<16x16xi1>
    %13 = arith.extui %12 : vector<16x16xi1> to vector<16x16xi32>
    %14 = arith.sitofp %13 : vector<16x16xi32> to vector<16x16xf32>
    %15 = vector.shape_cast %14 : vector<16x16xf32> to vector<1x16x16xf32>
    %16 = vector.broadcast %15 : vector<1x16x16xf32> to vector<2x16x16xf32>
    %17 = tpu.iota {dimensions = array<i32: 0>} : vector<16x16xi32>
    %18 = tpu.iota {dimensions = array<i32: 1>} : vector<16x16xi32>
    %19 = arith.subi %17, %18 : vector<16x16xi32>
    %c-1_i32_2 = arith.constant -1 : i32
    %20 = vector.broadcast %c-1_i32_2 : i32 to vector<16x16xi32>
    %21 = arith.cmpi sge, %19, %20 : vector<16x16xi32>
    %c1_i32_3 = arith.constant 1 : i32
    %22 = vector.broadcast %c1_i32_3 : i32 to vector<16x16xi32>
    %23 = arith.cmpi sle, %19, %22 : vector<16x16xi32>
    %24 = arith.andi %21, %23 : vector<16x16xi1>
    %25 = arith.extui %24 : vector<16x16xi1> to vector<16x16xi32>
    %26 = arith.sitofp %25 : vector<16x16xi32> to vector<16x16xf32>
    %27 = vector.shape_cast %26 : vector<16x16xf32> to vector<1x16x16xf32>
    %28 = vector.broadcast %27 : vector<1x16x16xf32> to vector<2x16x16xf32>
    "tpu.trace_start"() <{level = 10 : i32, message = "bhj,bjw->bhw"}> : () -> ()
    %cst_4 = arith.constant dense<0.000000e+00> : vector<2x16x16xf32>
    %29 = tpu.matmul %4, %28, %cst_4 {dimension_numbers = #tpu.dot_dimension_numbers<[2], [1], [1], [2], [0, 0, 0, 1, 1, 2], [0], [0]>} : vector<2x16x16xf32>, vector<2x16x16xf32>, vector<2x16x16xf32> -> vector<2x16x16xf32>
    "tpu.trace_stop"() : () -> ()
    "tpu.trace_start"() <{level = 10 : i32, message = "bhi,biw->bhw"}> : () -> ()
    %cst_5 = arith.constant dense<0.000000e+00> : vector<2x16x16xf32>
    %30 = tpu.matmul %16, %29, %cst_5 {dimension_numbers = #tpu.dot_dimension_numbers<[2], [1], [1], [2], [0, 0, 0, 1, 1, 2], [0], [0]>} : vector<2x16x16xf32>, vector<2x16x16xf32>, vector<2x16x16xf32> -> vector<2x16x16xf32>
    %cst_6 = arith.constant 5.000000e-01 : f32
    "tpu.trace_stop"() : () -> ()
    %31 = vector.broadcast %cst_6 : f32 to vector<2x16x16xf32>
    %32 = arith.cmpf ogt, %30, %31 : vector<2x16x16xf32>
    %cst_7 = arith.constant 0.000000e+00 : f32
    %cst_8 = arith.constant 1.000000e+00 : f32
    %33 = vector.broadcast %cst_7 : f32 to vector<2x16x16xf32>
    %34 = vector.broadcast %cst_8 : f32 to vector<2x16x16xf32>
    %35 = arith.select %32, %33, %34 : vector<2x16x16xi1>, vector<2x16x16xf32>
    %c0_9 = arith.constant 0 : index
    %c0_10 = arith.constant 0 : index
    %c0_11 = arith.constant 0 : index
    %36 = vector.load %arg2[%c0_9, %c0_10, %c0_11] : memref<2x16x16xf32, #tpu.memory_space<vmem>>, vector<2x16x16xf32>
    tpu.vector_store %arg2[%c0_9, %c0_10, %c0_11], %35 {strides = array<i32>} : memref<2x16x16xf32, #tpu.memory_space<vmem>>, vector<2x16x16xf32>,
    return
  }
  func.func @transform_0(%arg0: i32) -> (i32, i32, i32) {
    %c0_i32 = arith.constant 0 : i32
    %c0_i32_0 = arith.constant 0 : i32
    %c0_i32_1 = arith.constant 0 : i32
    return %arg0, %c0_i32, %c0_i32_0 : i32, i32, i32
  }
  func.func @transform_1(%arg0: i32) -> (i32, i32, i32) {
    %c0_i32 = arith.constant 0 : i32
    %c0_i32_0 = arith.constant 0 : i32
    %c0_i32_1 = arith.constant 0 : i32
    return %arg0, %c0_i32, %c0_i32_0 : i32, i32, i32
  }
}

module attributes {stable_mosaic.version = 11 : i64} {
  func.func @_apply_kernel(%arg0: i32, %arg1: i32, %arg2: memref<1xf32, #tpu.memory_space<smem>>, %arg3: memref<1x1x256xf32, #tpu.memory_space<vmem>>, %arg4: memref<1x4x256xf32, #tpu.memory_space<vmem>>, %arg5: memref<1x4x256xf32, #tpu.memory_space<vmem>>) attributes {dimension_semantics = [#tpu.dimension_semantics<parallel>, #tpu.dimension_semantics<parallel>], iteration_bounds = array<i64: 2, 1>, scalar_prefetch = 0 : i64, scratch_operands = 0 : i64, tpu.core_type = #tpu.core_type<tc>, window_params = [{transform_indices = @transform_0, window_bounds = array<i64: 1>}, {transform_indices = @transform_1, window_bounds = array<i64: 1, 1, 256>}, {transform_indices = @transform_2, window_bounds = array<i64: 1, 4, 256>}, {transform_indices = @transform_3, window_bounds = array<i64: 1, 4, 256>}]} {
    %c0 = arith.constant 0 : index
    %0 = memref.load %arg2[%c0] : memref<1xf32, #tpu.memory_space<smem>>
    %c0_0 = arith.constant 0 : index
    %c0_1 = arith.constant 0 : index
    %c0_2 = arith.constant 0 : index
    %1 = vector.load %arg3[%c0_0, %c0_1, %c0_2] : memref<1x1x256xf32, #tpu.memory_space<vmem>>, vector<1x1x256xf32>
    %c0_3 = arith.constant 0 : index
    %c0_4 = arith.constant 0 : index
    %c0_5 = arith.constant 0 : index
    %2 = vector.load %arg4[%c0_3, %c0_4, %c0_5] : memref<1x4x256xf32, #tpu.memory_space<vmem>>, vector<1x4x256xf32>
    %3 = vector.broadcast %0 : f32 to vector<1x1x256xf32>
    %4 = arith.mulf %1, %3 : vector<1x1x256xf32>
    %5 = vector.broadcast %4 : vector<1x1x256xf32> to vector<1x4x256xf32>
    %6 = arith.mulf %2, %5 : vector<1x4x256xf32>
    %c0_6 = arith.constant 0 : index
    %c0_7 = arith.constant 0 : index
    %c0_8 = arith.constant 0 : index
    %7 = vector.load %arg5[%c0_6, %c0_7, %c0_8] : memref<1x4x256xf32, #tpu.memory_space<vmem>>, vector<1x4x256xf32>
    tpu.vector_store %arg5[%c0_6, %c0_7, %c0_8], %6 {strides = array<i32>} : memref<1x4x256xf32, #tpu.memory_space<vmem>>, vector<1x4x256xf32>,
    return
  }
  func.func @transform_0(%arg0: i32, %arg1: i32) -> i32 {
    %c0_i32 = arith.constant 0 : i32
    %c0_i32_0 = arith.constant 0 : i32
    return %c0_i32 : i32
  }
  func.func @transform_1(%arg0: i32, %arg1: i32) -> (i32, i32, i32) {
    %c0_i32 = arith.constant 0 : i32
    %c0_i32_0 = arith.constant 0 : i32
    %c0_i32_1 = arith.constant 0 : i32
    return %arg0, %c0_i32, %c0_i32_0 : i32, i32, i32
  }
  func.func @transform_2(%arg0: i32, %arg1: i32) -> (i32, i32, i32) {
    %c0_i32 = arith.constant 0 : i32
    %c0_i32_0 = arith.constant 0 : i32
    return %arg0, %arg1, %c0_i32 : i32, i32, i32
  }
  func.func @transform_3(%arg0: i32, %arg1: i32) -> (i32, i32, i32) {
    %c0_i32 = arith.constant 0 : i32
    %c0_i32_0 = arith.constant 0 : i32
    return %arg0, %arg1, %c0_i32 : i32, i32, i32
  }
}

</mosaic_0001>

<bundles_post_ra>
// kernel: drop_block_2d.3
= control target key start
LH: loop header
LB: loop body
LE: loop exit
PB: predicated region body
PF: predicated region fallthrough
CT: control target
= control target key end

     0   :  { %s428_s14 = smov 0   ;;  %s430_s15 = smov 0   ;;  %s461_s0 = inlined_call_operand.<no memory space> [shape: f32[1], index: 0, kind: input, shape index: {}]   ;;  %s462_s1 = inlined_call_operand.vmem [shape: f32[2,1,256], index: 1, kind: input, shape index: {}]   ;;  %s463_s2 = inlined_call_operand.vmem [shape: f32[2,4,256], index: 2, kind: input, shape index: {}]   ;;  %s464_s3 = inlined_call_operand.vmem [shape: f32[2,4,256], index: 3, kind: output, shape index: {}]  }
   0x1   :  { %8 = sst [smem:[#allocation2]] %s461_s0  ;;  %s432_s16 = smov 0  }
   0x2 LB: > { %s26_s0 = sadd.s32 1, %s399_s15  ;;  %p347_p0 = scmp.ge.s32.totalorder %s403_s16, 1  ;;  %s403_s16 = sphi %s432_s16, %s14_s16   ;;  %s399_s15 = sphi %s430_s15, %s466_s15   ;;  %s395_s14 = sphi %s428_s14, %s465_s14  }
   0x3   : > { %p28_p1 = scmp.ge.s32.totalorder %s26_s0, 2  ;;  %p167_p2 = scmp.lt.s32.totalorder %s403_s16, 3 }
   0x5   : > { %s468_s0 = smov (%p28_p1, %s26_s0), 0  ;;  %p168_p3 = pnand %p347_p0, %p167_p2 }
   0x6   : > { %p203_p4 = scmp.lt.s32.totalorder (!%p168_p3), %s395_s14, 1  ;;  %s225_s17 = sld [smem:[#allocation2]] (!%p168_p3) }
   0x7   : > { %171 = sbr.rel (%p168_p3) target bundleno = 26 (0x1a), region = 32 }
   0xc   : > { %s470_s14 = smov (!%p203_p4, %s395_s14), 1  ;;  %v228_v1 = vstv %s225_s17  ;;  %vm234_vm0 = vcmask 1043456  }
   0xd   : > { %s348_s18 = sshll.u32 %s470_s14, 1  ;;  %s355_s22 = sshll.u32 %s470_s14, 3 }
   0xe   : > { %s206_s21 = scalar_lea.vmem %s462_s1, %s348_s18  ;;  %s215_s25 = scalar_lea.vmem %s463_s2, %s355_s22 }
   0xf   : > { %v226_v0 = vld [vmem:[%s206_s21] sm:$0x3]  ;;  %s224_s28 = scalar_lea.vmem %s464_s3, %s355_s22 }
  0x10   : > { %v229_v2 = vmul.f32 %v228_v1, %v226_v0  ;;  %v227_v5 = vld [vmem:[%s215_s25] sm:$0xff] }
  0x12   : > { %v231_v3 = vperm.slane %v229_v2, 0  ;;  %v232_v4 = vperm.slane %v229_v2, 1 }
  0x14   : > { %v233_v6 = vrot.slane %v232_v4, 4 }
  0x16   : > { %v235_v7 = vsel %vm234_vm0, %v231_v3, %v233_v6 }
  0x17   : > { %v237_v8 = vmul.f32 %v235_v7, %v227_v5 }
  0x19   : > { %238 = vst [vmem:[%s224_s28] sm:$0xff] %v237_v8 }
  0x1a PF: > { %s14_s16 = sadd.s32 1, %s403_s16   ;;  %s465_s14 = smov %s399_s15 }
  0x1b   : > { %p11_p5 = scmp.ge.s32.totalorder %s14_s16, 4   ;;  %s466_s15 = smov %s468_s0 }
  0x1d   :  { %13 = sbr.rel (!%p11_p5) target bundleno = 2 (0x2), region = 65 }

// kernel: drop_block_2d.2
= control target key start
LH: loop header
LB: loop body
LE: loop exit
PB: predicated region body
PF: predicated region fallthrough
CT: control target
= control target key end

     0   :  { %v24_v0 = vlaneseq  ;;  %v202_v8 = vmov 1.0   ;;  %v203_v9 = vmov 0.0   ;;  %vm53_vm8 = vcmask 130048   ;;  %s250_s0 = inlined_call_operand.vmem [shape: f32[2,16,16], index: 0, kind: input, shape index: {}]   ;;  %s251_s1 = inlined_call_operand.vmem [shape: f32[2,16,16], index: 1, kind: output, shape index: {}]  }
   0x1   :  { %v8_v5 = vld [vmem:[%s250_s0] sm:$0xff]  ;;  %v10_v6 = vld [vmem:[%s250_s0 + $0x10] sm:$0xff]  ;;  %v9_v12 = vld [vmem:[%s250_s0 + $0x8] sm:$0xff] }
   0x2   :  { %v25_v1 = vshrl.u32 %v24_v0, 7  ;;  %v28_v2 = vand.u32 127, %v24_v0  ;;  %vm12_vm2 = vcmp.lt.f32.partialorder %v8_v5, 0.011111111  ;;  %vm14_vm3 = vcmp.lt.f32.partialorder %v10_v6, 0.011111111 }
   0x3   :  { %v180_v10 = vsel %vm12_vm2, 1.0, %v203_v9  ;;  %v182_v11 = vsel %vm14_vm3, 1.0, %v203_v9  ;;  %v11_v13 = vld [vmem:[%s250_s0 + $0x18] sm:$0xff]  ;;  %vm13_vm9 = vcmp.lt.f32.partialorder %v9_v12, 0.011111111 }
   0x4   :  { %v26_v3 = vadd.s32 8, %v25_v1  ;;  %v41_v4 = vsub.s32 %v25_v1, %v28_v2  ;;  %vm15_vm10 = vcmp.lt.f32.partialorder %v11_v13, 0.011111111  ;;  %v181_v14 = vsel %vm13_vm9, 1.0, %v203_v9 }
   0x5   :  { %v183_v15 = vsel %vm15_vm10, 1.0, %v203_v9  ;;  %v29_v16 = vsub.s32 %v28_v2, %v25_v1 }
   0x6   :  { %v42_v7 = vsub.s32 %v26_v3, %v28_v2  ;;  %vm43_vm0 = vcmp.ge.s32.totalorder %v41_v4, 4294967295  ;;  %vm45_vm1 = vcmp.le.s32.totalorder %v41_v4, 1  ;;  %v30_v19 = vsub.s32 %v28_v2, %v26_v3 }
   0x7   :  { %vm47_vm6 = vmand %vm43_vm0, %vm45_vm1  ;;  %vm31_vm11 = vcmp.ge.s32.totalorder %v29_v16, 4294967295  ;;  %vm33_vm12 = vcmp.le.s32.totalorder %v29_v16, 1 }
   0x8   :  { %vm44_vm4 = vcmp.ge.s32.totalorder %v42_v7, 4294967295  ;;  %vm46_vm5 = vcmp.le.s32.totalorder %v42_v7, 1  ;;  %vm35_vm13 = vmand %vm31_vm11, %vm33_vm12  ;;  %vm32_vm14 = vcmp.ge.s32.totalorder %v30_v19, 4294967295  ;;  %vm34_vm15 = vcmp.le.s32.totalorder %v30_v19, 1 }
   0x9   :  { %vm48_vm7 = vmand %vm44_vm4, %vm46_vm5  ;;  %v184_v22 = vsel %vm35_vm13, 1.0, %v203_v9 }
   0xa   :  { %188 = vmatpush.msk.msra.mxu0 %vm48_vm7, %v202_v8  ;;  %192 = vmatpush.msk.msra.mxu1 %vm48_vm7, %v202_v8  ;;  %vm36_vm0 = vmand %vm32_vm14, %vm34_vm15 }
   0xb   :  { %v185_v23 = vsel %vm36_vm0, 1.0, %v203_v9 }
   0xc   :  { %189 = vmatpush.msk.msra.mxu0 %vm47_vm6, %v202_v8  ;;  %193 = vmatpush.msk.msra.mxu1 %vm47_vm6, %v202_v8 }
   0xd   :  { %190 = vmatmul.msk.f32.vlgmr.msra.gmra.mxu0 %vm53_vm8, %v180_v10  ;;  %194 = vmatmul.msk.f32.vlgmr.msra.gmra.mxu1 %vm53_vm8, %v182_v11 }
  0x15   :  { %191 = vmatmul.msk.f32.gmra.mxu0 %vm53_vm8, %v181_v14  ;;  %195 = vmatmul.msk.f32.gmra.mxu1 %vm53_vm8, %v183_v15 }
  0x8a   :  { %v77_v17 = vpop.f32.mrf.mxu0  ;;  %v106_v18 = vpop.f32.mrf.mxu1 }
  0x92   :  { %v80_v20 = vpop.f32.mrf.mxu0  ;;  %v109_v21 = vpop.f32.mrf.mxu1 }
  0x93   :  { %132 = vmatpush.msra.mxu2 %v80_v20  ;;  %155 = vmatpush.msra.mxu3 %v109_v21 }
  0x95   :  { %133 = vmatpush.msra.mxu2 %v77_v17  ;;  %156 = vmatpush.msra.mxu3 %v106_v18 }
  0x96   :  { %196 = vmatmul.msk.f32.vlgmr.msra.gmra.mxu2 %vm53_vm8, %v184_v22  ;;  %198 = vmatmul.msk.f32.vlgmr.msra.gmra.mxu3 %vm53_vm8, %v184_v22 }
  0x9e   :  { %197 = vmatmul.msk.f32.gmra.mxu2 %vm53_vm8, %v185_v23  ;;  %199 = vmatmul.msk.f32.gmra.mxu3 %vm53_vm8, %v185_v23 }
 0x119   :  { %v135_v24 = vpop.f32.mrf.mxu2  ;;  %v158_v25 = vpop.f32.mrf.mxu3 }
 0x11a   :  { %vm164_vm1 = vcmp.gt.f32.partialorder %v135_v24, 0.5  ;;  %vm166_vm2 = vcmp.gt.f32.partialorder %v158_v25, 0.5 }
 0x11b   :  { %v168_v26 = vsel %vm164_vm1, 0.0, %v202_v8  ;;  %v170_v27 = vsel %vm166_vm2, 0.0, %v202_v8 }
 0x11c   :  { %172 = vst.msk [vmem:[%s251_s1] sm:$0xff] %vm53_vm8, %v168_v26 }
 0x11d   :  { %174 = vst.msk [vmem:[%s251_s1 + $0x10] sm:$0xff] %vm53_vm8, %v170_v27 }
 0x121   :  { %v138_v28 = vpop.f32.mrf.mxu2  ;;  %v161_v29 = vpop.f32.mrf.mxu3 }
 0x122   :  { %vm165_vm3 = vcmp.gt.f32.partialorder %v138_v28, 0.5  ;;  %vm167_vm4 = vcmp.gt.f32.partialorder %v161_v29, 0.5 }
 0x123   :  { %v169_v30 = vsel %vm165_vm3, 0.0, %v202_v8  ;;  %v171_v31 = vsel %vm167_vm4, 0.0, %v202_v8 }
 0x124   :  { %173 = vst.msk [vmem:[%s251_s1 + $0x8] sm:$0xff] %vm53_vm8, %v169_v30 }
 0x125   :  { %175 = vst.msk [vmem:[%s251_s1 + $0x18] sm:$0xff] %vm53_vm8, %v171_v31 }

</bundles_post_ra>
